<compile_context>
chip_gen: v7x
topology: tpu7x:2x2x1
jax: 0.10.0
libtpu: 0.0.40
codegen_flags: <defaults>
</compile_context>

<pallas_src>
import jax
import jax.numpy as jnp
from jax.experimental import pallas as pl
from jax.experimental.pallas import tpu as pltpu


# --------------------------------------------------------------------------- #
# Fused kernel: rows = packed groups of P low-res pixels, columns = [p][k][c]  #
# --------------------------------------------------------------------------- #
def _fused_kernel(x_ref, mask_ref,
                  wmain_ref, bmain_ref, wext1_ref, bext1_ref,
                  wt_ref, bt_ref, we2_ref, be2_ref, out_ref):
    f32 = jnp.float32
    x = x_ref[...].astype(f32)                                      # (TG, P*Cin)

    # main branch: 1x1 conv (BN scale folded into weight) + bias, pre-expanded
    # over the four 2x2 output offsets k and the P packed pixels.
    main = jnp.dot(x, wmain_ref[...], preferred_element_type=f32) + bmain_ref[...]

    # ext branch stage 1: 1x1 conv + BN + ReLU
    ext = jnp.dot(x, wext1_ref[...], preferred_element_type=f32) + bext1_ref[...]
    ext = jnp.maximum(ext, 0.0)                                     # (TG, P*Cint)

    # transposed conv 2x2 / stride 2 (all 4 offsets side by side) + BN + ReLU
    t = jnp.dot(ext, wt_ref[...], preferred_element_type=f32) + bt_ref[...]
    t = jnp.maximum(t, 0.0)                                         # (TG, P*4*Cint)

    # ext branch stage 2: 1x1 conv + BN + ReLU
    e2 = jnp.dot(t, we2_ref[...], preferred_element_type=f32) + be2_ref[...]
    e2 = jnp.maximum(e2, 0.0)                                       # (TG, P*4*Cout)

    # MaxUnpool2d(2) via precomputed 0/1 mask; Dropout2d(p=0) = identity;
    # residual add + final ReLU.
    unpooled = main * mask_ref[...].astype(f32)
    out_ref[...] = jnp.maximum(unpooled + e2, 0.0)


# --------------------------------------------------------------------------- #
# Weight packing: fold eval-mode BN scale, build block-diagonal packed weights #
# --------------------------------------------------------------------------- #
def _pack_weights(raw, P):
    """Columns are ordered [pixel p][offset k = kh*2+kw][channel c], c fastest."""
    cin, cout = raw["wm"].shape
    cint = raw["w1"].shape[1]
    f32 = jnp.float32

    wm_f = raw["wm"] * raw["sm"]                                   # (Cin, Cout)
    w1_f = raw["w1"] * raw["s1"]                                   # (Cin, Cint)
    # ConvTranspose2d weight (Cin, Cout, kH, kW) -> columns [k][c_int]
    wt_flat = jnp.transpose(raw["wt4"], (0, 2, 3, 1)).reshape(cint, 4 * cint)
    wt_f = wt_flat * jnp.tile(raw["st"], (1, 4))
    w2_f = raw["w2"] * raw["s2"]                                   # (Cint, Cout)

    eye_p = jnp.eye(P, dtype=f32)
    eye_pk = jnp.eye(4 * P, dtype=f32)
    return dict(
        w_main=jnp.kron(eye_p, jnp.tile(wm_f, (1, 4))),            # (P*Cin, P*4*Cout)
        b_main=jnp.tile(raw["bm"], (1, 4 * P)),                    # (1, P*4*Cout)
        w_ext1=jnp.kron(eye_p, w1_f),                              # (P*Cin, P*Cint)
        b_ext1=jnp.tile(raw["b1"], (1, P)),                        # (1, P*Cint)
        w_t=jnp.kron(eye_p, wt_f),                                 # (P*Cint, P*4*Cint)
        b_t=jnp.tile(raw["bt"], (1, 4 * P)),                       # (1, P*4*Cint)
        w_e2=jnp.kron(eye_pk, w2_f),                               # (P*4*Cint, P*4*Cout)
        b_e2=jnp.tile(raw["b2"], (1, 4 * P)),                      # (1, P*4*Cout)
    )


def _pick_pack(M, cout):
    """Pixels packed per kernel row so the output last dim is ~128 lanes."""
    P = max(1, min(8, 128 // (4 * cout)))
    while P > 1 and M % P:
        P -= 1
    return P


def _pick_tile_rows(G, max_tile=512):
    """Largest multiple-of-32 divisor of G (<= max_tile); prefer >= 2 grid steps."""
    divs = [t for t in range(32, min(G, max_tile) + 1, 32) if G % t == 0]
    if not divs:
        return G
    multi = [t for t in divs if G // t >= 2]
    return max(multi) if multi else max(divs)


# --------------------------------------------------------------------------- #
# Wrapper                                                                      #
# --------------------------------------------------------------------------- #
def upsampling_bottleneck(x_nchw, max_indices_nchw, raw_params, *, max_tile_rows=512):
    """Fused ENet UpsamplingBottleneck forward (eval-mode BN, dropout p=0).

    x_nchw: (N, Cin, H, W); max_indices_nchw: (N, Cout, H, W) flat indices into
    the (2H, 2W) output plane as produced by MaxPool2d(2, return_indices=True).
    Returns (N, Cout, 2H, 2W), matching the PyTorch module.
    """
    N, Cin, H, W = x_nchw.shape
    Cout = raw_params["wm"].shape[1]
    M = N * H * W
    P = _pick_pack(M, Cout)
    assert M % P == 0, (M, P)
    G = M // P
    n_cols = P * 4 * Cout

    packed = _pack_weights(raw_params, P)

    # ---- layout glue (would disappear entirely in an NHWC / channels-last
    # pipeline; kept outside the kernel on purpose) ----------------------------
    x_rows = (jnp.transpose(x_nchw, (0, 2, 3, 1))
              .reshape(G, P * Cin).astype(jnp.bfloat16))

    # 2-bit in-window unpool code -> int8 0/1 mask with the output's layout.
    W2 = 2 * W
    idx = max_indices_nchw.astype(jnp.int32)
    code = ((idx // W2) % 2) * 2 + (idx % 2)                    # (N, Cout, H, W) in {0..3}
    code = jnp.transpose(code, (0, 2, 3, 1))                    # (N, H, W, Cout)
    mask = (code[..., None, :] ==
            jnp.arange(4, dtype=jnp.int32)[:, None]).astype(jnp.int8)   # (N,H,W,4,Cout)
    mask = mask.reshape(G, n_cols)

    tile_g = _pick_tile_rows(G, max_tile_rows)

    full = lambda a: pl.BlockSpec(a.shape, lambda i: (0, 0))
    order = ("w_main", "b_main", "w_ext1", "b_ext1", "w_t", "b_t", "w_e2", "b_e2")
    in_specs = ([pl.BlockSpec((tile_g, P * Cin), lambda i: (i, 0)),      # x (bf16)
                 pl.BlockSpec((tile_g, n_cols), lambda i: (i, 0))]       # mask (int8)
                + [full(packed[k]) for k in order])                      # resident weights

    out = pl.pallas_call(
        _fused_kernel,
        out_shape=jax.ShapeDtypeStruct((G, n_cols), jnp.float32),
        grid_spec=pltpu.PrefetchScalarGridSpec(
            num_scalar_prefetch=0,
            grid=(G // tile_g,),
            in_specs=in_specs,
            out_specs=pl.BlockSpec((tile_g, n_cols), lambda i: (i, 0)),
        ),
        compiler_params=pltpu.CompilerParams(dimension_semantics=("parallel",)),
    )(x_rows, mask, *[packed[k] for k in order])

    # rows = P consecutive (n, h, w) pixels; cols = [p][kh][kw][c]  ->  NCHW
    y = out.reshape(N, H, W, 2, 2, Cout)
    y = jnp.transpose(y, (0, 5, 1, 3, 2, 4)).reshape(N, Cout, 2 * H, 2 * W)
    return y


# --------------------------------------------------------------------------- #
# Synthetic parameters + independent pure-JAX reference (module semantics)     #
# --------------------------------------------------------------------------- #
def make_params(key, in_channels, out_channels, internal_ratio=4, eps=1e-5):
    """Deterministic synthetic params with the shapes implied by __init__ (eval BN)."""
    cint = in_channels // internal_ratio
    ks = jax.random.split(key, 8)

    def bn(k, c):
        k1, k2, k3, k4 = jax.random.split(k, 4)
        gamma = jax.random.uniform(k1, (c,), minval=0.5, maxval=1.5)
        beta = 0.1 * jax.random.normal(k2, (c,))
        mean = 0.1 * jax.random.normal(k3, (c,))
        var = jax.random.uniform(k4, (c,), minval=0.5, maxval=1.5)
        scale = gamma / jnp.sqrt(var + eps)
        bias = beta - mean * scale
        return (scale.reshape(1, c).astype(jnp.float32),
                bias.reshape(1, c).astype(jnp.float32))

    wm = (jax.random.normal(ks[0], (in_channels, out_channels))
          / jnp.sqrt(in_channels)).astype(jnp.float32)
    w1 = (jax.random.normal(ks[1], (in_channels, cint))
          / jnp.sqrt(in_channels)).astype(jnp.float32)
    wt4 = (jax.random.normal(ks[2], (cint, cint, 2, 2))
           / jnp.sqrt(4 * cint)).astype(jnp.float32)      # PyTorch (Cin, Cout, kH, kW)
    w2 = (jax.random.normal(ks[3], (cint, out_channels))
          / jnp.sqrt(cint)).astype(jnp.float32)

    sm, bm = bn(ks[4], out_channels)
    s1, b1 = bn(ks[5], cint)
    st, bt = bn(ks[6], cint)
    s2, b2 = bn(ks[7], out_channels)
    return dict(wm=wm, sm=sm, bm=bm, w1=w1, s1=s1, b1=b1,
                wt4=wt4, st=st, bt=bt, w2=w2, s2=s2, b2=b2)


def ref_forward(x, idx, p):
    """Independent pure-JAX reference (NCHW), eval-mode BN, p=0 dropout."""
    N, _, H, W = x.shape
    cint = p["w1"].shape[1]
    H2, W2 = 2 * H, 2 * W
    prec = jax.lax.Precision.HIGHEST
    relu = lambda a: jnp.maximum(a, 0.0)
    bnv = lambda v: v.reshape(-1)[None, :, None, None]

    main = jnp.einsum('nchw,co->nohw', x, p["wm"], precision=prec)
    main = main * bnv(p["sm"]) + bnv(p["bm"])

    flat = jnp.arange(H2)[:, None] * W2 + jnp.arange(W2)[None, :]
    idx_up = jnp.repeat(jnp.repeat(idx, 2, axis=2), 2, axis=3)
    main_up = jnp.where(idx_up == flat[None, None],
                        jnp.repeat(jnp.repeat(main, 2, axis=2), 2, axis=3), 0.0)

    ext = relu(jnp.einsum('nchw,ci->nihw', x, p["w1"], precision=prec)
               * bnv(p["s1"]) + bnv(p["b1"]))
    t = jnp.einsum('nihw,iokl->nohkwl', ext, p["wt4"], precision=prec)
    t = t.reshape(N, cint, H2, W2)
    t = relu(t * bnv(p["st"]) + bnv(p["bt"]))
    ext2 = relu(jnp.einsum('nihw,io->nohw', t, p["w2"], precision=prec)
                * bnv(p["s2"]) + bnv(p["b2"]))
    return relu(main_up + ext2)


# --------------------------------------------------------------------------- #
if __name__ == "__main__":
    N, Cin, H, W = 2, 16, 16, 16
    Cout, internal_ratio = 8, 4

    raw = make_params(jax.random.PRNGKey(1), Cin, Cout, internal_ratio)

    key = jax.random.PRNGKey(0)
    kx, kh_, kw_ = jax.random.split(key, 3)
    x = jax.random.normal(kx, (N, Cin, H, W), dtype=jnp.float32)
    # The kernel streams x as bf16; evaluate the reference at the same
    # bf16-rounded input so the comparison isolates kernel correctness.
    x_q = x.astype(jnp.bfloat16).astype(jnp.float32)

    # max_indices as produced by MaxPool2d(2, return_indices=True) on a
    # (N, Cout, 2H, 2W) map: each index points inside its own 2x2 window.
    rh = jax.random.randint(kh_, (N, Cout, H, W), 0, 2)
    rw = jax.random.randint(kw_, (N, Cout, H, W), 0, 2)
    hh = jnp.arange(H)[None, None, :, None]
    ww = jnp.arange(W)[None, None, None, :]
    max_indices = ((2 * hh + rh) * (2 * W) + (2 * ww + rw)).astype(jnp.int32)

    fwd = jax.jit(upsampling_bottleneck)
    out = jax.block_until_ready(fwd(x_q, max_indices, raw))

    ref = ref_forward(x_q, max_indices, raw)
    assert out.shape == (N, Cout, 2 * H, 2 * W), out.shape
    err = float(jnp.max(jnp.abs(out - ref)))
    assert err < 5e-3, f"max abs err {err}"

    print("KERNEL_OK")
</pallas_src>

<mosaic_0001>
module attributes {stable_mosaic.version = 11 : i64} {
  func.func @_fused_kernel(%arg0: i32, %arg1: memref<64x64xbf16, #tpu.memory_space<vmem>>, %arg2: memref<64x128xi8, #tpu.memory_space<vmem>>, %arg3: memref<64x128xf32, #tpu.memory_space<vmem>>, %arg4: memref<1x128xf32, #tpu.memory_space<vmem>>, %arg5: memref<64x16xf32, #tpu.memory_space<vmem>>, %arg6: memref<1x16xf32, #tpu.memory_space<vmem>>, %arg7: memref<16x64xf32, #tpu.memory_space<vmem>>, %arg8: memref<1x64xf32, #tpu.memory_space<vmem>>, %arg9: memref<64x128xf32, #tpu.memory_space<vmem>>, %arg10: memref<1x128xf32, #tpu.memory_space<vmem>>, %arg11: memref<64x128xf32, #tpu.memory_space<vmem>>) attributes {dimension_semantics = [#tpu.dimension_semantics<parallel>], iteration_bounds = array<i64: 2>, scalar_prefetch = 0 : i64, scratch_operands = 0 : i64, tpu.core_type = #tpu.core_type<tc>, window_params = [{transform_indices = @transform_0, window_bounds = array<i64: 64, 64>}, {transform_indices = @transform_1, window_bounds = array<i64: 64, 128>}, {pipeline_mode = #tpu.pipeline_mode<synchronous>, transform_indices = @transform_2, window_bounds = array<i64: 64, 128>}, {pipeline_mode = #tpu.pipeline_mode<synchronous>, transform_indices = @transform_3, window_bounds = array<i64: 1, 128>}, {pipeline_mode = #tpu.pipeline_mode<synchronous>, transform_indices = @transform_4, window_bounds = array<i64: 64, 16>}, {pipeline_mode = #tpu.pipeline_mode<synchronous>, transform_indices = @transform_5, window_bounds = array<i64: 1, 16>}, {pipeline_mode = #tpu.pipeline_mode<synchronous>, transform_indices = @transform_6, window_bounds = array<i64: 16, 64>}, {pipeline_mode = #tpu.pipeline_mode<synchronous>, transform_indices = @transform_7, window_bounds = array<i64: 1, 64>}, {pipeline_mode = #tpu.pipeline_mode<synchronous>, transform_indices = @transform_8, window_bounds = array<i64: 64, 128>}, {pipeline_mode = #tpu.pipeline_mode<synchronous>, transform_indices = @transform_9, window_bounds = array<i64: 1, 128>}, {transform_indices = @transform_10, window_bounds = array<i64: 64, 128>}]} {
    %c0 = arith.constant 0 : index
    %c0_0 = arith.constant 0 : index
    %0 = vector.load %arg1[%c0, %c0_0] : memref<64x64xbf16, #tpu.memory_space<vmem>>, vector<64x64xbf16>
    %1 = arith.extf %0 : vector<64x64xbf16> to vector<64x64xf32>
    %c0_1 = arith.constant 0 : index
    %c0_2 = arith.constant 0 : index
    %2 = vector.load %arg3[%c0_1, %c0_2] : memref<64x128xf32, #tpu.memory_space<vmem>>, vector<64x128xf32>
    %cst = arith.constant dense<0.000000e+00> : vector<64x128xf32>
    %3 = tpu.matmul %1, %2, %cst {dimension_numbers = #tpu.dot_dimension_numbers<[1], [0], [0], [1], [0, 0, 1, 1], [], []>} : vector<64x64xf32>, vector<64x128xf32>, vector<64x128xf32> -> vector<64x128xf32>
    %c0_3 = arith.constant 0 : index
    %c0_4 = arith.constant 0 : index
    %4 = vector.load %arg4[%c0_3, %c0_4] : memref<1x128xf32, #tpu.memory_space<vmem>>, vector<1x128xf32>
    %5 = vector.broadcast %4 : vector<1x128xf32> to vector<64x128xf32>
    %6 = arith.addf %3, %5 : vector<64x128xf32>
    %c0_5 = arith.constant 0 : index
    %c0_6 = arith.constant 0 : index
    %7 = vector.load %arg5[%c0_5, %c0_6] : memref<64x16xf32, #tpu.memory_space<vmem>>, vector<64x16xf32>
    %cst_7 = arith.constant dense<0.000000e+00> : vector<64x16xf32>
    %8 = tpu.matmul %1, %7, %cst_7 {dimension_numbers = #tpu.dot_dimension_numbers<[1], [0], [0], [1], [0, 0, 1, 1], [], []>} : vector<64x64xf32>, vector<64x16xf32>, vector<64x16xf32> -> vector<64x16xf32>
    %c0_8 = arith.constant 0 : index
    %c0_9 = arith.constant 0 : index
    %9 = vector.load %arg6[%c0_8, %c0_9] : memref<1x16xf32, #tpu.memory_space<vmem>>, vector<1x16xf32>
    %10 = vector.broadcast %9 : vector<1x16xf32> to vector<64x16xf32>
    %11 = arith.addf %8, %10 : vector<64x16xf32>
    %cst_10 = arith.constant 0.000000e+00 : f32
    %12 = vector.broadcast %cst_10 : f32 to vector<64x16xf32>
    %13 = arith.maximumf %11, %12 : vector<64x16xf32>
    %c0_11 = arith.constant 0 : index
    %c0_12 = arith.constant 0 : index
    %14 = vector.load %arg7[%c0_11, %c0_12] : memref<16x64xf32, #tpu.memory_space<vmem>>, vector<16x64xf32>
    %cst_13 = arith.constant dense<0.000000e+00> : vector<64x64xf32>
    %15 = tpu.matmul %13, %14, %cst_13 {dimension_numbers = #tpu.dot_dimension_numbers<[1], [0], [0], [1], [0, 0, 1, 1], [], []>} : vector<64x16xf32>, vector<16x64xf32>, vector<64x64xf32> -> vector<64x64xf32>
    %c0_14 = arith.constant 0 : index
    %c0_15 = arith.constant 0 : index
    %16 = vector.load %arg8[%c0_14, %c0_15] : memref<1x64xf32, #tpu.memory_space<vmem>>, vector<1x64xf32>
    %17 = vector.broadcast %16 : vector<1x64xf32> to vector<64x64xf32>
    %18 = arith.addf %15, %17 : vector<64x64xf32>
    %cst_16 = arith.constant 0.000000e+00 : f32
    %19 = vector.broadcast %cst_16 : f32 to vector<64x64xf32>
    %20 = arith.maximumf %18, %19 : vector<64x64xf32>
    %c0_17 = arith.constant 0 : index
    %c0_18 = arith.constant 0 : index
    %21 = vector.load %arg9[%c0_17, %c0_18] : memref<64x128xf32, #tpu.memory_space<vmem>>, vector<64x128xf32>
    %cst_19 = arith.constant dense<0.000000e+00> : vector<64x128xf32>
    %22 = tpu.matmul %20, %21, %cst_19 {dimension_numbers = #tpu.dot_dimension_numbers<[1], [0], [0], [1], [0, 0, 1, 1], [], []>} : vector<64x64xf32>, vector<64x128xf32>, vector<64x128xf32> -> vector<64x128xf32>
    %c0_20 = arith.constant 0 : index
    %c0_21 = arith.constant 0 : index
    %23 = vector.load %arg10[%c0_20, %c0_21] : memref<1x128xf32, #tpu.memory_space<vmem>>, vector<1x128xf32>
    %24 = vector.broadcast %23 : vector<1x128xf32> to vector<64x128xf32>
    %25 = arith.addf %22, %24 : vector<64x128xf32>
    %cst_22 = arith.constant 0.000000e+00 : f32
    %26 = vector.broadcast %cst_22 : f32 to vector<64x128xf32>
    %27 = arith.maximumf %25, %26 : vector<64x128xf32>
    %c0_23 = arith.constant 0 : index
    %c0_24 = arith.constant 0 : index
    %28 = vector.load %arg2[%c0_23, %c0_24] : memref<64x128xi8, #tpu.memory_space<vmem>>, vector<64x128xi8>
    %29 = arith.sitofp %28 : vector<64x128xi8> to vector<64x128xf32>
    %30 = arith.mulf %6, %29 : vector<64x128xf32>
    %31 = arith.addf %30, %27 : vector<64x128xf32>
    %cst_25 = arith.constant 0.000000e+00 : f32
    %32 = vector.broadcast %cst_25 : f32 to vector<64x128xf32>
    %33 = arith.maximumf %31, %32 : vector<64x128xf32>
    %c0_26 = arith.constant 0 : index
    %c0_27 = arith.constant 0 : index
    %34 = vector.load %arg11[%c0_26, %c0_27] : memref<64x128xf32, #tpu.memory_space<vmem>>, vector<64x128xf32>
    tpu.vector_store %arg11[%c0_26, %c0_27], %33 {strides = array<i32>} : memref<64x128xf32, #tpu.memory_space<vmem>>, vector<64x128xf32>,
    return
  }
  func.func @transform_0(%arg0: i32) -> (i32, i32) {
    %c0_i32 = arith.constant 0 : i32
    %c0_i32_0 = arith.constant 0 : i32
    return %arg0, %c0_i32 : i32, i32
  }
  func.func @transform_1(%arg0: i32) -> (i32, i32) {
    %c0_i32 = arith.constant 0 : i32
    %c0_i32_0 = arith.constant 0 : i32
    return %arg0, %c0_i32 : i32, i32
  }
  func.func @transform_2(%arg0: i32) -> (i32, i32) {
    %c0_i32 = arith.constant 0 : i32
    %c0_i32_0 = arith.constant 0 : i32
    %c0_i32_1 = arith.constant 0 : i32
    return %c0_i32, %c0_i32_0 : i32, i32
  }
  func.func @transform_3(%arg0: i32) -> (i32, i32) {
    %c0_i32 = arith.constant 0 : i32
    %c0_i32_0 = arith.constant 0 : i32
    %c0_i32_1 = arith.constant 0 : i32
    return %c0_i32, %c0_i32_0 : i32, i32
  }
  func.func @transform_4(%arg0: i32) -> (i32, i32) {
    %c0_i32 = arith.constant 0 : i32
    %c0_i32_0 = arith.constant 0 : i32
    %c0_i32_1 = arith.constant 0 : i32
    return %c0_i32, %c0_i32_0 : i32, i32
  }
  func.func @transform_5(%arg0: i32) -> (i32, i32) {
    %c0_i32 = arith.constant 0 : i32
    %c0_i32_0 = arith.constant 0 : i32
    %c0_i32_1 = arith.constant 0 : i32
    return %c0_i32, %c0_i32_0 : i32, i32
  }
  func.func @transform_6(%arg0: i32) -> (i32, i32) {
    %c0_i32 = arith.constant 0 : i32
    %c0_i32_0 = arith.constant 0 : i32
    %c0_i32_1 = arith.constant 0 : i32
    return %c0_i32, %c0_i32_0 : i32, i32
  }
  func.func @transform_7(%arg0: i32) -> (i32, i32) {
    %c0_i32 = arith.constant 0 : i32
    %c0_i32_0 = arith.constant 0 : i32
    %c0_i32_1 = arith.constant 0 : i32
    return %c0_i32, %c0_i32_0 : i32, i32
  }
  func.func @transform_8(%arg0: i32) -> (i32, i32) {
    %c0_i32 = arith.constant 0 : i32
    %c0_i32_0 = arith.constant 0 : i32
    %c0_i32_1 = arith.constant 0 : i32
    return %c0_i32, %c0_i32_0 : i32, i32
  }
  func.func @transform_9(%arg0: i32) -> (i32, i32) {
    %c0_i32 = arith.constant 0 : i32
    %c0_i32_0 = arith.constant 0 : i32
    %c0_i32_1 = arith.constant 0 : i32
    return %c0_i32, %c0_i32_0 : i32, i32
  }
  func.func @transform_10(%arg0: i32) -> (i32, i32) {
    %c0_i32 = arith.constant 0 : i32
    %c0_i32_0 = arith.constant 0 : i32
    return %arg0, %c0_i32 : i32, i32
  }
}

</mosaic_0001>

<bundles_post_ra>
// kernel: upsampling_bottleneck.1
= control target key start
LH: loop header
LB: loop body
LE: loop exit
PB: predicated region body
PF: predicated region fallthrough
CT: control target
= control target key end

     0   :  { %s1440_s13 = smov 0   ;;  %s1640_s0 = inlined_call_operand.vmem [shape: bf16[128,64], index: 0, kind: input, shape index: {}]   ;;  %s1641_s1 = inlined_call_operand.vmem [shape: s8[128,128], index: 1, kind: input, shape index: {}]   ;;  %s1642_s2 = inlined_call_operand.vmem [shape: f32[64,128], index: 2, kind: input, shape index: {}]   ;;  %s1643_s3 = inlined_call_operand.vmem [shape: f32[1,128], index: 3, kind: input, shape index: {}]   ;;  %s1644_s4 = inlined_call_operand.vmem [shape: f32[64,16], index: 4, kind: input, shape index: {}]   ;;  %s1645_s5 = inlined_call_operand.vmem [shape: f32[1,16], index: 5, kind: input, shape index: {}]   ;;  %s1646_s6 = inlined_call_operand.vmem [shape: f32[16,64], index: 6, kind: input, shape index: {}]   ;;  %s1647_s7 = inlined_call_operand.vmem [shape: f32[1,64], index: 7, kind: input, shape index: {}]   ;;  %s1648_s8 = inlined_call_operand.vmem [shape: f32[64,128], index: 8, kind: input, shape index: {}]   ;;  %s1649_s9 = inlined_call_operand.vmem [shape: f32[1,128], index: 9, kind: input, shape index: {}]   ;;  %s1650_s10 = inlined_call_operand.vmem [shape: f32[128,128], index: 10, kind: output, shape index: {}]  }
   0x1 LB: > { %s1091_s14 = sadd.s32 4294967295, %s1383_s13   ;;  %p1095_p0 = scmp.ge.s32.totalorder %s1383_s13, 1  ;;  %s1383_s13 = sphi %s1440_s13, %s20_s13  }
   0x2   : > { %p324_p1 = scmp.lt.s32.totalorder %s1383_s13, 3 }
   0x4   : > { %p325_p2 = pnand %p1095_p0, %p324_p1 }
   0x5   : > { %v546_v0 = vld [vmem:[%s1644_s4] sm:$0xff] (!%p325_p2)  ;;  %v547_v1 = vld [vmem:[%s1644_s4 + $0x8] sm:$0xff] (!%p325_p2)  ;;  %v548_v2 = vld [vmem:[%s1644_s4 + $0x10] sm:$0xff] (!%p325_p2)  ;;  %s1096_s21 = sshll.u32 (!%p325_p2), %s1091_s14, 3  ;;  %vm416_vm0 = vcmask (!%p325_p2), 523264   ;;  %vm683_vm1 = vcmask (!%p325_p2), 130048  }
   0x6   : > { %328 = sbr.rel (%p325_p2) target bundleno = 694 (0x2b6), region = 60  ;;  %v1333_v3 = vpack.c.bf16 (!%p325_p2), %v547_v1, %v546_v0  ;;  %v549_v4 = vld [vmem:[%s1644_s4 + $0x18] sm:$0xff] (!%p325_p2)  ;;  %p368_p3 = scmp.lt.s32.totalorder (!%p325_p2), %s1096_s21, 15  ;;  %v550_v6 = vld [vmem:[%s1644_s4 + $0x20] sm:$0xff] (!%p325_p2)  ;;  %v551_v7 = vld [vmem:[%s1644_s4 + $0x28] sm:$0xff] (!%p325_p2) }
   0x7   : > { %v1337_v5 = vpack.c.bf16 (!%p325_p2), %v549_v4, %v548_v2  ;;  %v401_v8 = vld [vmem:[%s1642_s2] sm:$0xff] (!%p325_p2)  ;;  %v402_v9 = vld [vmem:[%s1642_s2 + $0x8] sm:$0xff] (!%p325_p2)  ;;  %v403_v10 = vld [vmem:[%s1642_s2 + $0x10] sm:$0xff] (!%p325_p2)  ;;  %v1341_v14 = vpack.c.bf16 (!%p325_p2), %v551_v7, %v550_v6  ;;  %s1098_s25 = sshll.u32 (!%p325_p2), %s1091_s14, 1 }
   0x8   : > { %1334 = vmatprep.subr.bf16.mxu1 (!%p325_p2), %v1333_v3  ;;  %v404_v11 = vld [vmem:[%s1642_s2 + $0x18] sm:$0xff] (!%p325_p2)  ;;  %v1317_v12 = vpack.c.bf16 (!%p325_p2), %v402_v9, %v401_v8  ;;  %v405_v15 = vld [vmem:[%s1642_s2 + $0x20] sm:$0xff] (!%p325_p2)  ;;  %v406_v16 = vld [vmem:[%s1642_s2 + $0x28] sm:$0xff] (!%p325_p2)  ;;  %p374_p4 = scmp.lt.s32.totalorder (!%p325_p2), %s1098_s25, 3 }
   0x9   : > { %1336 = vmatpush3.bf16.msra.mxu1 (!%p325_p2), %v1333_v3  ;;  %v1321_v13 = vpack.c.bf16 (!%p325_p2), %v404_v11, %v403_v10  ;;  %v552_v17 = vld [vmem:[%s1644_s4 + $0x30] sm:$0xff] (!%p325_p2)  ;;  %v553_v18 = vld [vmem:[%s1644_s4 + $0x38] sm:$0xff] (!%p325_p2)  ;;  %v1325_v21 = vpack.c.bf16 (!%p325_p2), %v406_v16, %v405_v15  ;;  %v674_v27 = vld [vmem:[%s1646_s6] sm:$0xff] (!%p325_p2) }
   0xa   : > { %1338 = vmatprep.subr.bf16.mxu1 (!%p325_p2), %v1337_v5  ;;  %1318 = vmatprep.subr.bf16.mxu0 (!%p325_p2), %v1317_v12  ;;  %v1345_v22 = vpack.c.bf16 (!%p325_p2), %v553_v18, %v552_v17  ;;  %v407_v23 = vld [vmem:[%s1642_s2 + $0x30] sm:$0xff] (!%p325_p2)  ;;  %v408_v24 = vld [vmem:[%s1642_s2 + $0x38] sm:$0xff] (!%p325_p2)  ;;  %v675_v28 = vld [vmem:[%s1646_s6 + $0x8] sm:$0xff] (!%p325_p2) }
   0xb   : > { %1320 = vmatpush3.bf16.msra.mxu0 (!%p325_p2), %v1317_v12  ;;  %v1329_v25 = vpack.c.bf16 (!%p325_p2), %v408_v24, %v407_v23  ;;  %v1349_v31 = vpack.c.bf16 (!%p325_p2), %v675_v28, %v674_v27  ;;  %v821_v39 = vld [vmem:[%s1648_s8] sm:$0xff] (!%p325_p2)  ;;  %v822_v40 = vld [vmem:[%s1648_s8 + $0x8] sm:$0xff] (!%p325_p2)  ;;  %v823_v42 = vld [vmem:[%s1648_s8 + $0x10] sm:$0xff] (!%p325_p2) }
   0xc   : > { %1322 = vmatprep.subr.bf16.mxu0 (!%p325_p2), %v1321_v13  ;;  %v1353_v41 = vpack.c.bf16 (!%p325_p2), %v822_v40, %v821_v39  ;;  %v824_v43 = vld [vmem:[%s1648_s8 + $0x18] sm:$0xff] (!%p325_p2)  ;;  %v825_v45 = vld [vmem:[%s1648_s8 + $0x20] sm:$0xff] (!%p325_p2)  ;;  %v826_v46 = vld [vmem:[%s1648_s8 + $0x28] sm:$0xff] (!%p325_p2) }
   0xd   : > { %s1652_s21 = smov (!%p368_p3, %s1096_s21), 15  ;;  %1340 = vmatpush3.bf16.msra.mxu1 %v1337_v5  ;;  %v1357_v44 = vpack.c.bf16 %v824_v43, %v823_v42  ;;  %v1361_v47 = vpack.c.bf16 %v826_v46, %v825_v45  ;;  %v1111_v48 = vld [vmem:[%s1645_s5] ss:$0 sm:$0xff]  ;;  %v827_v17 = vld [vmem:[%s1648_s8 + $0x30] sm:$0xff]  ;;  %v828_v18 = vld [vmem:[%s1648_s8 + $0x38] sm:$0xff]  ;;  %s1654_s25 = smov (!%p374_p4, %s1098_s25), 3 }
   0xe   : > { %s1097_s18 = sshll.u32 %s1652_s21, 2  ;;  %1342 = vmatprep.subr.bf16.mxu1 %v1341_v14  ;;  %s1099_s26 = sshll.u32 %s1654_s25, 3 }
   0xf   : > { %s1498_s30 = scalar_lea.vmem %s1640_s0, %s1097_s18  ;;  %1324 = vmatpush3.bf16.msra.mxu0 %v1321_v13  ;;  %s377_s29 = scalar_lea.vmem %s1641_s1, %s1099_s26 }
  0x10   : > { %v1141_v19 = vld [vmem:[%s1498_s30] sm:$0xff]   ;;  %1326 = vmatprep.subr.bf16.mxu0 %v1325_v21  ;;  %v1156_v26 = vld [vmem:[%s1498_s30 + $0x8] sm:$0xff]   ;;  %v1157_v32 = vld [vmem:[%s1498_s30 + $0x10] sm:$0xff]   ;;  %s1101_s14 = sshll.u32 %s1652_s21, 3 }
  0x11   : > { %v1142_v20 = vunpack.c.l.bf16 %v1141_v19  ;;  %1344 = vmatpush3.bf16.msra.mxu1 %v1341_v14  ;;  %v1143_v29 = vunpack.c.h.bf16 %v1141_v19  ;;  %v1146_v30 = vunpack.c.l.bf16 %v1156_v26  ;;  %v1147_v33 = vunpack.c.h.bf16 %v1156_v26  ;;  %v1158_v35 = vld [vmem:[%s1498_s30 + $0x18] sm:$0xff]   ;;  %v973_v45 = vld [vmem:[%s377_s29] sm:$0xff]  ;;  %s1618_s21 = scalar_lea.vmem %s1650_s10, %s1101_s14 }
  0x12   : > { %1346 = vmatprep.subr.bf16.mxu1 %v1345_v22  ;;  %v1150_v34 = vunpack.c.l.bf16 %v1157_v32  ;;  %v1151_v36 = vunpack.c.h.bf16 %v1157_v32  ;;  %v1154_v37 = vunpack.c.l.bf16 %v1158_v35  ;;  %v1155_v38 = vunpack.c.h.bf16 %v1158_v35 }
  0x13   : > { %1261 = vmatprep.mubr.msk.f32.mxu1 %vm416_vm0, %v1142_v20  ;;  %1233 = vmatprep.mubr.msk.f32.mxu0 %vm416_vm0, %v1142_v20  ;;  %v1365_v19 = vpack.c.bf16 %v828_v18, %v827_v17  ;;  %v1120_v20 = vld [vmem:[%s1647_s7] ss:$0 sm:$0xff]  ;;  %v976_v46 = vunpack.c.1.s8 %v973_v45 }
  0x14   : > { %1328 = vmatpush3.bf16.msra.mxu0 %v1325_v21 }
  0x15   : > { %1348 = vmatpush3.bf16.msra.mxu1 %v1345_v22  ;;  %1330 = vmatprep.subr.bf16.mxu0 %v1329_v25 }
  0x16   : > { %1354 = vmatprep.subr.bf16.mxu1 %v1353_v41 }
  0x18   : > { %1262 = vmatmul.mubr.msk.f32.vlgmr.msra.gmra.mrb[0].mxu1 %vm416_vm0, %v1143_v29  ;;  %1332 = vmatpush3.bf16.msra.mxu0 %v1329_v25 }
  0x19   : > { %1264 = vmatprep.mubr.msk.f32.mxu1 %vm416_vm0, %v1146_v30  ;;  %1350 = vmatprep.subr.bf16.mxu0 %v1349_v31 }
  0x1a   : > { %1356 = vmatpush3.bf16.msra.mxu1 %v1353_v41 }
  0x1b   : > { %1234 = vmatmul.mubr.msk.f32.vlgmr.msra.gmra.mrb[0].mxu0 %vm416_vm0, %v1143_v29  ;;  %1358 = vmatprep.subr.bf16.mxu1 %v1357_v44 }
  0x1c   : > { %1265 = vmatmul.mubr.msk.f32.gmra.mrb[2].mxu1 %vm416_vm0, %v1147_v33  ;;  %1352 = vmatpush3.bf16.msra.mxu0 %v1349_v31 }
  0x1d   : > { %1267 = vmatprep.mubr.msk.f32.mxu1 %vm416_vm0, %v1150_v34  ;;  %1236 = vmatprep.mubr.msk.f32.mxu0 %vm416_vm0, %v1146_v30 }
  0x1e   : > { %1360 = vmatpush3.bf16.msra.mxu1 %v1357_v44 }
  0x1f   : > { %1237 = vmatmul.mubr.msk.f32.gmra.mrb[2].mxu0 %vm416_vm0, %v1147_v33  ;;  %1362 = vmatprep.subr.bf16.mxu1 %v1361_v47 }
  0x20   : > { %1268 = vmatmul.mubr.msk.f32.gmra.mrb[4].mxu1 %vm416_vm0, %v1151_v36  ;;  %1239 = vmatprep.mubr.msk.f32.mxu0 %vm416_vm0, %v1150_v34 }
  0x21   : > { %1270 = vmatprep.mubr.msk.f32.mxu1 %vm416_vm0, %v1154_v37 }
  0x22   : > { %1364 = vmatpush3.bf16.msra.mxu1 %v1361_v47  ;;  %v1102_v47 = vld [vmem:[%s1643_s3] ss:$0 sm:$0xff] }
  0x23   : > { %1240 = vmatmul.mubr.msk.f32.gmra.mrb[4].mxu0 %vm416_vm0, %v1151_v36  ;;  %1366 = vmatprep.subr.bf16.mxu1 %v1365_v19 }
  0x24   : > { %1271 = vmatmul.mubr.msk.f32.gmra.mrb[6].mxu1 %vm416_vm0, %v1155_v38  ;;  %1242 = vmatprep.mubr.msk.f32.mxu0 %vm416_vm0, %v1154_v37 }
  0x26   : > { %1368 = vmatpush3.bf16.msra.mxu1 %v1365_v19 }
  0x27   : > { %1243 = vmatmul.mubr.msk.f32.gmra.mrb[6].mxu0 %vm416_vm0, %v1155_v38 }
  0xeb   : > { %v1263_v49 = vpop.f32.mrb[0].mxu1 }
  0xec   : > { %v633_v50 = vadd.f32 %v1263_v49, %v1111_v48  ;;  %v627_v51 = vpop.f32.mrb[1].mxu1  ;;  %v1605_v49 = vld [vmem:[%s1649_s9] ss:$0 sm:$0xff] }
  0xed   : > { %v628_v52 = vadd.f32 %v1111_v48, %v627_v51  ;;  %v984_v51 = vcvt.s32.f32 %v976_v46 }
  0xee   : > { %v1553_v53 = vpop.f32.mrb[0].mxu0  ;;  %v667_v57 = vmax.f32 %v633_v50, 0.0 }
  0xef   : > { %v666_v54 = vmax.f32 %v628_v52, 0.0  ;;  %v1266_v55 = vpop.f32.mrb[2].mxu1  ;;  %v1555_v56 = vpop.f32.mrb[1].mxu0  ;;  %v513_v50 = vadd.f32 %v1553_v53, %v1102_v47  ;;  %v978_v52 = vunpack.c.3.s8 %v973_v45 }
  0xf0   : > { %v643_v58 = vadd.f32 %v1266_v55, %v1111_v48  ;;  %v637_v59 = vpop.f32.mrb[3].mxu1  ;;  %v508_v55 = vadd.f32 %v1102_v47, %v1555_v56 }
  0xf1   : > { %v638_v60 = vadd.f32 %v1111_v48, %v637_v59  ;;  %1277 = vmatprep.mubr.msk.f32.mxu0 %vm683_vm1, %v666_v54  ;;  %v974_v54 = vld [vmem:[%s377_s29 + $0x8] sm:$0xff]  ;;  %v986_v53 = vcvt.s32.f32 %v978_v52 }
  0xf2   : > { %1278 = vmatmul.mubr.msk.f32.vlgmr.msra.gmra.mrb[8].mxu0 %vm683_vm1, %v667_v57  ;;  %v1559_v61 = vpop.f32.mrb[2].mxu0  ;;  %v669_v1 = vmax.f32 %v643_v58, 0.0  ;;  %v977_v58 = vunpack.c.2.s8 %v973_v45 }
  0xf3   : > { %v668_v62 = vmax.f32 %v638_v60, 0.0  ;;  %v1269_v63 = vpop.f32.mrb[4].mxu1  ;;  %v1561_v0 = vpop.f32.mrb[3].mxu0 }
  0xf4   : > { %v653_v2 = vadd.f32 %v1269_v63, %v1111_v48  ;;  %v647_v3 = vpop.f32.mrb[5].mxu1  ;;  %v980_v63 = vunpack.c.1.s8 %v974_v54  ;;  %v985_v56 = vcvt.s32.f32 %v977_v58 }
  0xf5   : > { %v648_v4 = vadd.f32 %v1111_v48, %v647_v3  ;;  %1280 = vmatprep.mubr.msk.f32.mxu0 %vm683_vm1, %v668_v62  ;;  %v992_v3 = vmul.f32 %v984_v51, %v513_v50 }
  0xf6   : > { %1281 = vmatmul.mubr.msk.f32.gmra.mrb[10].mxu0 %vm683_vm1, %v669_v1  ;;  %v1565_v5 = vpop.f32.mrb[4].mxu0  ;;  %v671_v9 = vmax.f32 %v653_v2, 0.0  ;;  %v979_v1 = vunpack.c.0.s8 %v974_v54 }
  0xf7   : > { %v670_v6 = vmax.f32 %v648_v4, 0.0  ;;  %v1272_v7 = vpop.f32.mrb[6].mxu1  ;;  %v1567_v8 = vpop.f32.mrb[5].mxu0  ;;  %v523_v4 = vadd.f32 %v1559_v61, %v1102_v47  ;;  %v988_v61 = vcvt.s32.f32 %v980_v63 }
  0xf8   : > { %v663_v10 = vadd.f32 %v1272_v7, %v1111_v48  ;;  %v657_v11 = vpop.f32.mrb[7].mxu1  ;;  %v987_v19 = vcvt.s32.f32 %v979_v1 }
  0xf9   : > { %v658_v12 = vadd.f32 %v1111_v48, %v657_v11  ;;  %1283 = vmatprep.mubr.msk.f32.mxu0 %vm683_vm1, %v670_v6  ;;  %v975_v48 = vunpack.c.0.s8 %v973_v45 }
  0xfa   : > { %1284 = vmatmul.mubr.msk.f32.gmra.mrb[12].mxu0 %vm683_vm1, %v671_v9  ;;  %v1571_v13 = vpop.f32.mrb[6].mxu0  ;;  %v673_v16 = vmax.f32 %v663_v10, 0.0  ;;  %v518_v9 = vadd.f32 %v1102_v47, %v1561_v0 }
  0xfb   : > { %v672_v14 = vmax.f32 %v658_v12, 0.0  ;;  %v1573_v15 = vpop.f32.mrb[7].mxu0  ;;  %v983_v57 = vcvt.s32.f32 %v975_v48  ;;  %v982_v12 = vunpack.c.3.s8 %v974_v54 }
  0xfd   : > { %1286 = vmatprep.mubr.msk.f32.mxu0 %vm683_vm1, %v672_v14  ;;  %v991_v7 = vmul.f32 %v983_v57, %v508_v55  ;;  %v981_v14 = vunpack.c.2.s8 %v974_v54 }
  0xfe   : > { %1287 = vmatmul.mubr.msk.f32.gmra.mrb[14].mxu0 %vm683_vm1, %v673_v16 }
 0x1c5   : > { %v1279_v21 = vpop.f32.mrb[8].mxu0 }
 0x1c6   : > { %v780_v22 = vadd.f32 %v1279_v21, %v1120_v20  ;;  %v774_v23 = vpop.f32.mrb[9].mxu0  ;;  %v994_v21 = vmul.f32 %v986_v53, %v523_v4 }
 0x1c7   : > { %v775_v24 = vadd.f32 %v1120_v20, %v774_v23 }
 0x1c8   : > { %v814_v27 = vmax.f32 %v780_v22, 0.0  ;;  %v533_v22 = vadd.f32 %v1565_v5, %v1102_v47 }
 0x1c9   : > { %v813_v25 = vmax.f32 %v775_v24, 0.0  ;;  %v1282_v26 = vpop.f32.mrb[10].mxu0 }
 0x1ca   : > { %v790_v28 = vadd.f32 %v1282_v26, %v1120_v20  ;;  %v784_v29 = vpop.f32.mrb[11].mxu0  ;;  %v528_v26 = vadd.f32 %v1102_v47, %v1567_v8 }
 0x1cb   : > { %v785_v30 = vadd.f32 %v1120_v20, %v784_v29  ;;  %1305 = vmatprep.mubr.msk.f32.mxu1 %vm416_vm0, %v813_v25  ;;  %v993_v25 = vmul.f32 %v985_v56, %v518_v9 }
 0x1cc   : > { %1306 = vmatmul.mubr.msk.f32.vlgmr.msra.gmra.mrb[8].mxu1 %vm416_vm0, %v814_v27  ;;  %v816_v33 = vmax.f32 %v790_v28, 0.0 }
 0x1cd   : > { %v815_v31 = vmax.f32 %v785_v30, 0.0  ;;  %v1285_v32 = vpop.f32.mrb[12].mxu0 }
 0x1ce   : > { %v800_v34 = vadd.f32 %v1285_v32, %v1120_v20  ;;  %v794_v35 = vpop.f32.mrb[13].mxu0 }
 0x1cf   : > { %v795_v36 = vadd.f32 %v1120_v20, %v794_v35  ;;  %1308 = vmatprep.mubr.msk.f32.mxu1 %vm416_vm0, %v815_v31 }
 0x1d0   : > { %1309 = vmatmul.mubr.msk.f32.gmra.mrb[10].mxu1 %vm416_vm0, %v816_v33  ;;  %v818_v39 = vmax.f32 %v800_v34, 0.0  ;;  %v990_v33 = vcvt.s32.f32 %v982_v12  ;;  %v989_v34 = vcvt.s32.f32 %v981_v14 }
 0x1d1   : > { %v817_v37 = vmax.f32 %v795_v36, 0.0  ;;  %v1288_v38 = vpop.f32.mrb[14].mxu0  ;;  %v996_v36 = vmul.f32 %v988_v61, %v533_v22 }
 0x1d2   : > { %v810_v40 = vadd.f32 %v1288_v38, %v1120_v20  ;;  %v804_v41 = vpop.f32.mrb[15].mxu0 }
 0x1d3   : > { %v805_v42 = vadd.f32 %v1120_v20, %v804_v41  ;;  %1311 = vmatprep.mubr.msk.f32.mxu1 %vm416_vm0, %v817_v37  ;;  %v543_v37 = vadd.f32 %v1571_v13, %v1102_v47 }
 0x1d4   : > { %1312 = vmatmul.mubr.msk.f32.gmra.mrb[12].mxu1 %vm416_vm0, %v818_v39  ;;  %v820_v44 = vmax.f32 %v810_v40, 0.0  ;;  %v995_v39 = vmul.f32 %v987_v19, %v528_v26  ;;  %v538_v40 = vadd.f32 %v1102_v47, %v1573_v15 }
 0x1d5   : > { %v819_v43 = vmax.f32 %v805_v42, 0.0  ;;  %v998_v50 = vmul.f32 %v990_v33, %v543_v37 }
 0x1d6   : > { %v997_v15 = vmul.f32 %v989_v34, %v538_v40 }
 0x1d7   : > { %1314 = vmatprep.mubr.msk.f32.mxu1 %vm416_vm0, %v819_v43 }
 0x1d8   : > { %1315 = vmatmul.mubr.msk.f32.gmra.mrb[14].mxu1 %vm416_vm0, %v820_v44 }
 0x29f   : > { %v1307_v59 = vpop.f32.mrb[8].mxu1 }
 0x2a0   : > { %v932_v60 = vadd.f32 %v1307_v59, %v1605_v49  ;;  %v926_v62 = vpop.f32.mrb[9].mxu1 }
 0x2a1   : > { %v927_v2 = vadd.f32 %v1605_v49, %v926_v62 }
 0x2a2   : > { %v966_v6 = vmax.f32 %v932_v60, 0.0 }
 0x2a3   : > { %v965_v10 = vmax.f32 %v927_v2, 0.0  ;;  %v1310_v11 = vpop.f32.mrb[10].mxu1 }
 0x2a4   : > { %v1000_v16 = vadd.f32 %v992_v3, %v966_v6  ;;  %v942_v17 = vadd.f32 %v1310_v11, %v1605_v49  ;;  %v936_v18 = vpop.f32.mrb[11].mxu1 }
 0x2a5   : > { %v999_v20 = vadd.f32 %v991_v7, %v965_v10  ;;  %v937_v0 = vadd.f32 %v1605_v49, %v936_v18 }
 0x2a6   : > { %v1008_v23 = vmax.f32 %v1000_v16, 0.0  ;;  %v968_v24 = vmax.f32 %v942_v17, 0.0 }
 0x2a7   : > { %v1007_v27 = vmax.f32 %v999_v20, 0.0  ;;  %v967_v28 = vmax.f32 %v937_v0, 0.0  ;;  %v1313_v29 = vpop.f32.mrb[12].mxu1 }
 0x2a8   : > { %1016 = vst [vmem:[%s1618_s21 + $0x8] sm:$0xff] %v1008_v23  ;;  %v1002_v30 = vadd.f32 %v994_v21, %v968_v24  ;;  %v952_v31 = vadd.f32 %v1313_v29, %v1605_v49  ;;  %v946_v32 = vpop.f32.mrb[13].mxu1 }
 0x2a9   : > { %1015 = vst [vmem:[%s1618_s21] sm:$0xff] %v1007_v27  ;;  %v1001_v35 = vadd.f32 %v993_v25, %v967_v28  ;;  %v947_v5 = vadd.f32 %v1605_v49, %v946_v32 }
 0x2aa   : > { %v1010_v8 = vmax.f32 %v1002_v30, 0.0  ;;  %v970_v38 = vmax.f32 %v952_v31, 0.0 }
 0x2ab   : > { %v1009_v41 = vmax.f32 %v1001_v35, 0.0  ;;  %v969_v42 = vmax.f32 %v947_v5, 0.0  ;;  %v1316_v43 = vpop.f32.mrb[14].mxu1 }
 0x2ac   : > { %1018 = vst [vmem:[%s1618_s21 + $0x18] sm:$0xff] %v1010_v8  ;;  %v1004_v44 = vadd.f32 %v996_v36, %v970_v38  ;;  %v962_v45 = vadd.f32 %v1316_v43, %v1605_v49  ;;  %v956_v46 = vpop.f32.mrb[15].mxu1 }
 0x2ad   : > { %1017 = vst [vmem:[%s1618_s21 + $0x10] sm:$0xff] %v1009_v41  ;;  %v1003_v48 = vadd.f32 %v995_v39, %v969_v42  ;;  %v957_v13 = vadd.f32 %v1605_v49, %v956_v46 }
 0x2ae   : > { %v1012_v51 = vmax.f32 %v1004_v44, 0.0  ;;  %v972_v52 = vmax.f32 %v962_v45, 0.0 }
 0x2af   : > { %v1011_v47 = vmax.f32 %v1003_v48, 0.0  ;;  %v971_v54 = vmax.f32 %v957_v13, 0.0 }
 0x2b0   : > { %1020 = vst [vmem:[%s1618_s21 + $0x28] sm:$0xff] %v1012_v51  ;;  %v1006_v55 = vadd.f32 %v998_v50, %v972_v52 }
 0x2b1   : > { %1019 = vst [vmem:[%s1618_s21 + $0x20] sm:$0xff] %v1011_v47  ;;  %v1005_v57 = vadd.f32 %v997_v15, %v971_v54 }
 0x2b2   : > { %v1014_v58 = vmax.f32 %v1006_v55, 0.0 }
 0x2b3   : > { %v1013_v59 = vmax.f32 %v1005_v57, 0.0 }
 0x2b4   : > { %1022 = vst [vmem:[%s1618_s21 + $0x38] sm:$0xff] %v1014_v58 }
 0x2b5   : > { %1021 = vst [vmem:[%s1618_s21 + $0x30] sm:$0xff] %v1013_v59 }
 0x2b6 PF: > { %s20_s13 = sadd.s32 1, %s1383_s13  }
 0x2b7   : > { %p17_p5 = scmp.ge.s32.totalorder %s20_s13, 4  }
 0x2b9   :  { %19 = sbr.rel (!%p17_p5) target bundleno = 1 (0x1), region = 93 }

</bundles_post_ra>
